<compile_context>
chip_gen: v7x
topology: tpu7x:2x2x1
jax: 0.10.0
libtpu: 0.0.40
codegen_flags: <defaults>
</compile_context>

<pallas_src>
import functools

import jax
import jax.numpy as jnp
from jax.experimental import pallas as pl
from jax.experimental.pallas import tpu as pltpu


def _largest_aligned_divisor(n: int, target: int, align: int = 128) -> int:
    """Largest divisor d of n with d <= target and d % 128 == 0 (or d == n when n<=target)."""
    if n <= target:
        return n
    k = -(-n // target)                 # smallest split count that fits the target
    limit = min(n, k + 4096)            # bounded search keeps wrapper tracing cheap
    while k <= limit:
        if n % k == 0 and (n // k) % align == 0:
            return n // k
        k += 1
    # TODO(synk): no 128-aligned divisor of HW under the budget — fall back to one
    # full-HW tile (always correct; only suboptimal for huge images with awkward H*W).
    return n


def _object_aware_lsgan_kernel(x_ref, lab_ref, cnt_ref, ssq_ref, *,
                               target_val: float, num_classes: int,
                               lane: int, n_chunks: int, unroll):
    """Grid = (splits, N, hw_tiles_per_split).

    Accumulates lane-partial per-class pixel counts cnt[s, lane] and masked channel-summed
    squared errors ssq[s, lane] directly into the resident output blocks (accumulator
    pattern over the last grid axis). All scalar finalization happens in the JAX epilogue.
    """
    t = pl.program_id(2)

    # Hoisted (S, 1) iota — the compare below broadcasts it across lanes (feedback #4).
    class_ids = jax.lax.broadcasted_iota(jnp.int32, (num_classes, 1), 0)

    def accum(i, carry):
        cnt_p, ssq_p = carry
        if n_chunks == 1:
            # Whole tile fits one compute chunk — static full-view loads.
            x = x_ref[0].astype(jnp.float32)                        # (C, lane)
            lab = lab_ref[0].astype(jnp.int32)                      # (1, lane)
        else:
            off = pl.multiple_of(i * lane, 128)
            x = x_ref[0, :, pl.ds(off, lane)].astype(jnp.float32)   # (C, lane)
            lab = lab_ref[0, :, pl.ds(off, lane)].astype(jnp.int32) # (1, lane)
        d = x - jnp.float32(target_val)
        sq = jnp.sum(d * d, axis=0, keepdims=True)                  # (1, lane)  (no /C: folded into epilogue)
        m = (lab == class_ids).astype(jnp.float32)                  # (S, lane)  in-kernel one-hot
        return cnt_p + m, ssq_p + m * sq                            # pure VPU adds, no XLU

    init = (jnp.zeros((num_classes, lane), jnp.float32),
            jnp.zeros((num_classes, lane), jnp.float32))
    if n_chunks == 1:
        cnt_p, ssq_p = accum(0, init)
    else:
        cnt_p, ssq_p = jax.lax.fori_loop(0, n_chunks, accum, init, unroll=unroll)

    @pl.when(t == 0)
    def _():
        cnt_ref[...] = jnp.zeros_like(cnt_ref)
        ssq_ref[...] = jnp.zeros_like(ssq_ref)

    # One VMEM accumulate per tile into the resident (1, 1, S, lane) output blocks.
    cnt_ref[...] = cnt_ref[...] + cnt_p[None, None]
    ssq_ref[...] = ssq_ref[...] + ssq_p[None, None]


def _reduced_gan_loss_single_scale(x_nchw, labels_nhw, num_classes: int,
                                   target_is_real: bool = True,
                                   max_hw_tile: int = 65536,
                                   max_lane: int = 512,
                                   vmem_input_budget: int = 16 * 1024 * 1024):
    """Object-aware reduced LSGAN loss (scalar) for one scale's prediction."""
    N, C, H, W = x_nchw.shape
    assert labels_nhw.shape == (N, H, W)
    HW = H * W

    # Flatten spatial so the lane axis is dense. NO dtype casts here (feedback: bf16
    # logits / int8 labels stream straight from HBM; upcasts happen in-kernel post-load).
    x = x_nchw.reshape(N, C, HW)
    lab = labels_nhw.reshape(N, 1, HW)

    # DMA tile: largest 128-aligned divisor of HW that fits the lane cap and the
    # double-buffered-input VMEM budget (no jnp.pad pre-pass, feedback #1/#2).
    bytes_per_px = 2 * (C * x.dtype.itemsize + lab.dtype.itemsize)   # x2: double-buffered
    target_tile = min(max_hw_tile, max(128, vmem_input_budget // bytes_per_px))
    hw_tile = _largest_aligned_divisor(HW, target_tile)
    num_tiles = HW // hw_tile

    # Compute chunk (== accumulator lane width): decoupled from the DMA tile so the
    # [S, lane] mask / mask*sq temporaries stay in vregs regardless of image size or S.
    lane = _largest_aligned_divisor(hw_tile, min(hw_tile, max_lane))
    n_chunks = hw_tile // lane
    unroll = True if n_chunks <= 8 else 8

    # Optional 2-way split of the HW-tile loop: feeds v7x's second TensorCore even at
    # N == 1; harmless on single-TC chips (v5e/v6e).
    num_splits = 2 if (num_tiles >= 2 and num_tiles % 2 == 0) else 1
    tiles_per_split = num_tiles // num_splits

    kernel = functools.partial(
        _object_aware_lsgan_kernel,
        target_val=1.0 if target_is_real else 0.0,
        num_classes=num_classes, lane=lane, n_chunks=n_chunks, unroll=unroll)

    out_sds = jax.ShapeDtypeStruct((num_splits, N, num_classes, lane), jnp.float32)
    acc_spec = pl.BlockSpec((1, 1, num_classes, lane), lambda h, n, t: (h, n, 0, 0))

    cnt_out, ssq_out = pl.pallas_call(
        kernel,
        out_shape=(out_sds, out_sds),
        grid_spec=pltpu.PrefetchScalarGridSpec(
            num_scalar_prefetch=0,
            grid=(num_splits, N, tiles_per_split),
            in_specs=[
                pl.BlockSpec((1, C, hw_tile),
                             lambda h, n, t: (n, 0, h * tiles_per_split + t)),
                pl.BlockSpec((1, 1, hw_tile),
                             lambda h, n, t: (n, 0, h * tiles_per_split + t)),
            ],
            out_specs=[acc_spec, acc_spec],
        ),
        compiler_params=pltpu.CompilerParams(
            # split / batch axes parallel; HW-tile axis is the accumulation axis.
            dimension_semantics=("parallel", "parallel", "arbitrary"),
            vmem_limit_bytes=32 * 1024 * 1024,
        ),
        cost_estimate=pl.CostEstimate(
            flops=int(N * HW * (3 * C + 4 * num_classes)),
            transcendentals=0,
            bytes_accessed=int(x.size * x.dtype.itemsize
                               + lab.size * lab.dtype.itemsize
                               + 2 * num_splits * N * num_classes * lane * 4),
        ),
    )(x, lab)

    # Tiny JAX epilogue on (splits, N, S, lane) partials: cross-lane/split reduce,
    # class-balanced divide (1/C channel-mean folded in), class sum, batch mean.
    cnt = jnp.sum(cnt_out, axis=(0, 3))                                   # (N, S)
    ssq = jnp.sum(ssq_out, axis=(0, 3))                                   # (N, S)
    per_n = jnp.sum(ssq / (C * num_classes * jnp.maximum(cnt, 1.0)), axis=1)
    return jnp.mean(per_n)


def multi_scale_discriminator_loss(preds, labels_nhw, num_classes: int,
                                   target_is_real: bool = True):
    """Pallas equivalent of MultiScaleDiscriminatorLossWrapper.forward.

    preds: a single [N,C,H,W] prediction, or a list of per-scale predictions (each
    possibly a feature list -> take the last entry). labels_nhw: integer label map at full
    resolution (nearest-neighbour subsampled to each scale's resolution).
    """
    if not isinstance(preds, (list, tuple)):
        preds = [preds]
    total = jnp.float32(0.0)
    for pred in preds:
        if isinstance(pred, (list, tuple)):
            pred = pred[-1]
        _, _, H, W = pred.shape
        lab = labels_nhw
        if lab.shape[1:] != (H, W):
            fh = labels_nhw.shape[1] // H
            fw = labels_nhw.shape[2] // W
            lab = labels_nhw[:, ::fh, ::fw]   # nearest-neighbour resize of the label map
        scale_loss = _reduced_gan_loss_single_scale(pred, lab, num_classes, target_is_real)
        # wrapper's per-scale mean over non-batch dims is a no-op (scalar loss tensor)
        total = total + scale_loss
    return total / len(preds)


def multi_scale_discriminator_loss_ref(preds, labels_nhw, num_classes: int,
                                       target_is_real: bool = True):
    """Pure-JAX reference matching the PyTorch semantics of the chosen submodules."""
    if not isinstance(preds, (list, tuple)):
        preds = [preds]
    target = 1.0 if target_is_real else 0.0
    total = jnp.float32(0.0)
    for pred in preds:
        if isinstance(pred, (list, tuple)):
            pred = pred[-1]
        _, _, H, W = pred.shape
        lab = labels_nhw
        if lab.shape[1:] != (H, W):
            fh = labels_nhw.shape[1] // H
            fw = labels_nhw.shape[2] // W
            lab = labels_nhw[:, ::fh, ::fw]
        sem = jax.nn.one_hot(lab, num_classes, dtype=jnp.float32)      # [N,H,W,S]
        sem = jnp.transpose(sem, (0, 3, 1, 2))                         # [N,S,H,W]
        L = (pred.astype(jnp.float32) - target) ** 2                   # unreduced loss
        l = L.mean(axis=1)                                             # [N,H,W]
        cnt = sem.sum(axis=(2, 3))                                     # [N,S]
        inv = (H * W) / (num_classes * jnp.maximum(cnt, 1.0))          # [N,S]
        w = jnp.einsum("nshw,ns->nhw", sem, inv)
        total = total + (w * l).mean()
    return total / len(preds)


if __name__ == "__main__":
    key = jax.random.PRNGKey(0)
    k1, k2, k3, k4, k5 = jax.random.split(key, 5)

    # Small multi-scale config consistent with the module's typical use.
    N, C, H, W = 2, 4, 16, 16   # discriminator logits at full scale
    S = 8                       # number of semantic classes

    # Two-scale discriminator output; second scale is half resolution and wrapped in a
    # feature list (the wrapper takes its last element, as in the PyTorch module).
    pred_full = jax.random.normal(k1, (N, C, H, W), dtype=jnp.float32)
    pred_half = jax.random.normal(k3, (N, C, H // 2, W // 2), dtype=jnp.float32)
    preds = [pred_full, [pred_half]]

    # Integer label map only — the one-hot semantics never exist in HBM.
    labels = jax.random.randint(k2, (N, H, W), 0, S)

    loss = multi_scale_discriminator_loss(preds, labels, num_classes=S, target_is_real=True)
    loss = jax.block_until_ready(loss)
    loss_ref = multi_scale_discriminator_loss_ref(preds, labels, num_classes=S,
                                                  target_is_real=True)
    assert jnp.allclose(loss, loss_ref, rtol=1e-5, atol=1e-6), (loss, loss_ref)

    # Exercise the multi-tile + 2-way-split path and the in-tile chunked (fori_loop) path
    # on a slightly larger map, against the same reference.
    Hb, Wb = 64, 64
    pred_big = jax.random.normal(k4, (1, C, Hb, Wb), dtype=jnp.float32)
    labels_big = jax.random.randint(k5, (1, Hb, Wb), 0, S)
    ref_big = multi_scale_discriminator_loss_ref(pred_big, labels_big, num_classes=S)

    tiled = _reduced_gan_loss_single_scale(pred_big, labels_big, num_classes=S,
                                           max_hw_tile=512)    # 8 HW tiles, 2-way split
    tiled = jax.block_until_ready(tiled)
    assert jnp.allclose(tiled, ref_big, rtol=1e-5, atol=1e-6), (tiled, ref_big)

    chunked = _reduced_gan_loss_single_scale(pred_big, labels_big, num_classes=S)
    chunked = jax.block_until_ready(chunked)                    # 1 tile, 8 in-tile chunks
    assert jnp.allclose(chunked, ref_big, rtol=1e-5, atol=1e-6), (chunked, ref_big)

    print("KERNEL_OK")
</pallas_src>

<mosaic_0001>
module attributes {stable_mosaic.version = 11 : i64} {
  func.func @_object_aware_lsgan_kernel(%arg0: i32, %arg1: i32, %arg2: i32, %arg3: memref<1x4x256xf32, #tpu.memory_space<vmem>>, %arg4: memref<1x1x256xi32, #tpu.memory_space<vmem>>, %arg5: memref<1x1x8x256xf32, #tpu.memory_space<vmem>>, %arg6: memref<1x1x8x256xf32, #tpu.memory_space<vmem>>) attributes {dimension_semantics = [#tpu.dimension_semantics<parallel>, #tpu.dimension_semantics<parallel>, #tpu.dimension_semantics<arbitrary>], iteration_bounds = array<i64: 1, 2, 1>, scalar_prefetch = 0 : i64, scratch_operands = 0 : i64, tpu.core_type = #tpu.core_type<tc>, window_params = [{transform_indices = @transform_0, window_bounds = array<i64: 1, 4, 256>}, {transform_indices = @transform_1, window_bounds = array<i64: 1, 1, 256>}, {transform_indices = @transform_2, window_bounds = array<i64: 1, 1, 8, 256>}, {transform_indices = @transform_3, window_bounds = array<i64: 1, 1, 8, 256>}]} {
    %0 = tpu.iota {dimensions = array<i32: 0>} : vector<8x1xi32>
    %cst = arith.constant 0.000000e+00 : f32
    %1 = vector.broadcast %cst : f32 to vector<8x256xf32>
    %cst_0 = arith.constant 0.000000e+00 : f32
    %2 = vector.broadcast %cst_0 : f32 to vector<8x256xf32>
    %c0 = arith.constant 0 : index
    %c0_1 = arith.constant 0 : index
    %c0_2 = arith.constant 0 : index
    %3 = vector.load %arg3[%c0, %c0_1, %c0_2] : memref<1x4x256xf32, #tpu.memory_space<vmem>>, vector<1x4x256xf32>
    %4 = vector.shape_cast %3 : vector<1x4x256xf32> to vector<4x256xf32>
    %c0_3 = arith.constant 0 : index
    %c0_4 = arith.constant 0 : index
    %c0_5 = arith.constant 0 : index
    %5 = vector.load %arg4[%c0_3, %c0_4, %c0_5] : memref<1x1x256xi32, #tpu.memory_space<vmem>>, vector<1x1x256xi32>
    %6 = vector.shape_cast %5 : vector<1x1x256xi32> to vector<1x256xi32>
    %cst_6 = arith.constant 1.000000e+00 : f32
    %7 = vector.broadcast %cst_6 : f32 to vector<4x256xf32>
    %8 = arith.subf %4, %7 : vector<4x256xf32>
    %9 = arith.mulf %8, %8 : vector<4x256xf32>
    %cst_7 = arith.constant dense<0.000000e+00> : vector<256xf32>
    %10 = vector.multi_reduction <add>, %9, %cst_7 [0] : vector<4x256xf32> to vector<256xf32>
    %11 = vector.shape_cast %10 : vector<256xf32> to vector<1x256xf32>
    %12 = vector.broadcast %6 : vector<1x256xi32> to vector<8x256xi32>
    %13 = vector.broadcast %0 : vector<8x1xi32> to vector<8x256xi32>
    %14 = arith.cmpi eq, %12, %13 : vector<8x256xi32>
    %15 = arith.extui %14 : vector<8x256xi1> to vector<8x256xi32>
    %16 = arith.sitofp %15 : vector<8x256xi32> to vector<8x256xf32>
    %17 = arith.addf %1, %16 : vector<8x256xf32>
    %18 = vector.broadcast %11 : vector<1x256xf32> to vector<8x256xf32>
    %19 = arith.mulf %16, %18 : vector<8x256xf32>
    %20 = arith.addf %2, %19 : vector<8x256xf32>
    %c0_i32 = arith.constant 0 : i32
    %21 = arith.cmpi eq, %arg2, %c0_i32 : i32
    %22 = arith.extui %21 : i1 to i32
    %c0_i32_8 = arith.constant 0 : i32
    %23 = arith.cmpi ne, %22, %c0_i32_8 : i32
    scf.if %23 {
      %cst_25 = arith.constant 0.000000e+00 : f32
      %32 = vector.broadcast %cst_25 : f32 to vector<1x1x8x256xf32>
      %c0_26 = arith.constant 0 : index
      %c0_27 = arith.constant 0 : index
      %c0_28 = arith.constant 0 : index
      %c0_29 = arith.constant 0 : index
      %33 = vector.load %arg5[%c0_26, %c0_27, %c0_28, %c0_29] : memref<1x1x8x256xf32, #tpu.memory_space<vmem>>, vector<1x1x8x256xf32>
      tpu.vector_store %arg5[%c0_26, %c0_27, %c0_28, %c0_29], %32 {strides = array<i32>} : memref<1x1x8x256xf32, #tpu.memory_space<vmem>>, vector<1x1x8x256xf32>,
      %cst_30 = arith.constant 0.000000e+00 : f32
      %34 = vector.broadcast %cst_30 : f32 to vector<1x1x8x256xf32>
      %c0_31 = arith.constant 0 : index
      %c0_32 = arith.constant 0 : index
      %c0_33 = arith.constant 0 : index
      %c0_34 = arith.constant 0 : index
      %35 = vector.load %arg6[%c0_31, %c0_32, %c0_33, %c0_34] : memref<1x1x8x256xf32, #tpu.memory_space<vmem>>, vector<1x1x8x256xf32>
      tpu.vector_store %arg6[%c0_31, %c0_32, %c0_33, %c0_34], %34 {strides = array<i32>} : memref<1x1x8x256xf32, #tpu.memory_space<vmem>>, vector<1x1x8x256xf32>,
    } else {
    }
    %c0_9 = arith.constant 0 : index
    %c0_10 = arith.constant 0 : index
    %c0_11 = arith.constant 0 : index
    %c0_12 = arith.constant 0 : index
    %24 = vector.load %arg5[%c0_9, %c0_10, %c0_11, %c0_12] : memref<1x1x8x256xf32, #tpu.memory_space<vmem>>, vector<1x1x8x256xf32>
    %25 = vector.shape_cast %17 : vector<8x256xf32> to vector<1x1x8x256xf32>
    %26 = arith.addf %24, %25 : vector<1x1x8x256xf32>
    %c0_13 = arith.constant 0 : index
    %c0_14 = arith.constant 0 : index
    %c0_15 = arith.constant 0 : index
    %c0_16 = arith.constant 0 : index
    %27 = vector.load %arg5[%c0_13, %c0_14, %c0_15, %c0_16] : memref<1x1x8x256xf32, #tpu.memory_space<vmem>>, vector<1x1x8x256xf32>
    tpu.vector_store %arg5[%c0_13, %c0_14, %c0_15, %c0_16], %26 {strides = array<i32>} : memref<1x1x8x256xf32, #tpu.memory_space<vmem>>, vector<1x1x8x256xf32>,
    %c0_17 = arith.constant 0 : index
    %c0_18 = arith.constant 0 : index
    %c0_19 = arith.constant 0 : index
    %c0_20 = arith.constant 0 : index
    %28 = vector.load %arg6[%c0_17, %c0_18, %c0_19, %c0_20] : memref<1x1x8x256xf32, #tpu.memory_space<vmem>>, vector<1x1x8x256xf32>
    %29 = vector.shape_cast %20 : vector<8x256xf32> to vector<1x1x8x256xf32>
    %30 = arith.addf %28, %29 : vector<1x1x8x256xf32>
    %c0_21 = arith.constant 0 : index
    %c0_22 = arith.constant 0 : index
    %c0_23 = arith.constant 0 : index
    %c0_24 = arith.constant 0 : index
    %31 = vector.load %arg6[%c0_21, %c0_22, %c0_23, %c0_24] : memref<1x1x8x256xf32, #tpu.memory_space<vmem>>, vector<1x1x8x256xf32>
    tpu.vector_store %arg6[%c0_21, %c0_22, %c0_23, %c0_24], %30 {strides = array<i32>} : memref<1x1x8x256xf32, #tpu.memory_space<vmem>>, vector<1x1x8x256xf32>,
    return
  }
  func.func @transform_0(%arg0: i32, %arg1: i32, %arg2: i32) -> (i32, i32, i32) {
    %c1_i32 = arith.constant 1 : i32
    %0 = arith.muli %arg0, %c1_i32 : i32
    %1 = arith.addi %0, %arg2 : i32
    %c0_i32 = arith.constant 0 : i32
    %c0_i32_0 = arith.constant 0 : i32
    return %arg1, %c0_i32, %1 : i32, i32, i32
  }
  func.func @transform_1(%arg0: i32, %arg1: i32, %arg2: i32) -> (i32, i32, i32) {
    %c1_i32 = arith.constant 1 : i32
    %0 = arith.muli %arg0, %c1_i32 : i32
    %1 = arith.addi %0, %arg2 : i32
    %c0_i32 = arith.constant 0 : i32
    %c0_i32_0 = arith.constant 0 : i32
    return %arg1, %c0_i32, %1 : i32, i32, i32
  }
  func.func @transform_2(%arg0: i32, %arg1: i32, %arg2: i32) -> (i32, i32, i32, i32) {
    %c0_i32 = arith.constant 0 : i32
    %c0_i32_0 = arith.constant 0 : i32
    %c0_i32_1 = arith.constant 0 : i32
    return %arg0, %arg1, %c0_i32, %c0_i32_0 : i32, i32, i32, i32
  }
  func.func @transform_3(%arg0: i32, %arg1: i32, %arg2: i32) -> (i32, i32, i32, i32) {
    %c0_i32 = arith.constant 0 : i32
    %c0_i32_0 = arith.constant 0 : i32
    %c0_i32_1 = arith.constant 0 : i32
    return %arg0, %arg1, %c0_i32, %c0_i32_0 : i32, i32, i32, i32
  }
}

</mosaic_0001>

<bundles_post_ra>
// kernel: tpu_custom_call.1
= control target key start
LH: loop header
LB: loop body
LE: loop exit
PB: predicated region body
PF: predicated region fallthrough
CT: control target
= control target key end

     0   :  { %9 = vsyncpa [#allocation3], 0  ;;  %s1092_s0 = inlined_call_operand.hbm [shape: f32[2,4,256], index: 0, kind: input, shape index: {}]   ;;  %s1093_s1 = inlined_call_operand.hbm [shape: s32[2,1,256], index: 1, kind: input, shape index: {}]   ;;  %s1094_s2 = inlined_call_operand.hbm [shape: f32[1,2,8,256], index: 2, kind: output, shape index: {0}]   ;;  %s1095_s3 = inlined_call_operand.hbm [shape: f32[1,2,8,256], index: 3, kind: output, shape index: {1}]  }
   0x1   :  { %11 = vsyncpa [#allocation3 + $0x1], 0 }
   0x2   :  { %12 = vsyncpa [#allocation6], 0 }
   0x3   :  { %14 = vsyncpa [#allocation6 + $0x1], 0 }
   0x4   :  { %15 = vsyncpa [#allocation4], 0 }
   0x5   :  { %17 = vsyncpa [#allocation4 + $0x1], 0 }
   0x6   :  { %18 = vsyncpa [#allocation9], 0 }
   0x7   :  { %20 = vsyncpa [#allocation9 + $0x1], 0  ;;  %s837_s12 = smov 0   ;;  %s839_s13 = smov 0  }
   0x8   :  { %s841_s14 = smov 0   ;;  %s843_s15 = smov 0  }
   0x9   :  { %s845_s16 = smov 0   ;;  %s847_s17 = smov 0  }
   0xa LB: > { %s529_s18 = sadd.s32 4294967295, %s810_s17   ;;  %s530_s19 = sadd.s32 4294967294, %s810_s17   ;;  %s810_s17 = sphi %s847_s17, %s26_s17   ;;  %s806_s16 = sphi %s845_s16, %s1115_s16   ;;  %s802_s15 = sphi %s843_s15, %s1114_s15   ;;  %s798_s14 = sphi %s841_s14, %s1113_s14   ;;  %s794_s13 = sphi %s839_s13, %s1112_s13   ;;  %s790_s12 = sphi %s837_s12, %s1111_s12  }
   0xb   : > { %s41_s20 = sadd.s32 1, %s806_s16  ;;  %s56_s21 = sadd.s32 1, %s798_s14 }
   0xc   : > { %p43_p0 = scmp.ge.s32.totalorder %s41_s20, 2  ;;  %p63_p1 = scmp.ne.s32.totalorder %s798_s14, %s794_s13 }
   0xd   : > { %p64_p2 = scmp.eq.s32.totalorder %s810_s17, 0  ;;  %p69_p3 = scmp.ne.s32.totalorder %s794_s13, %s790_s12 }
   0xe   : > { %s1117_s20 = smov (%p43_p0, %s41_s20), 0  ;;  %p70_p5 = scmp.eq.s32.totalorder %s529_s18, 0 }
   0xf   : > { %p878_p4 = por %p64_p2, %p63_p1  ;;  %s51_s23 = ssub.s32 %s806_s16, %s1117_s20 }
  0x10   : > { %p125_p6 = scmp.eq.s32.totalorder %s529_s18, 1  ;;  %p54_p7 = scmp.eq.s32.totalorder %s51_s23, 0 }
  0x11   : > { %p884_p8 = por %p70_p5, %p69_p3  ;;  %p131_p10 = scmp.eq.s32.totalorder %s530_s19, 1 }
  0x12   : > { %p888_p9 = por %p125_p6, %p63_p1  ;;  %p581_p13 = scmp.lt.s32.totalorder %s810_s17, 2 }
  0x13   : > { %s1099_s24 = scalar_select %p884_p8, 1, 0 }
  0x14   : > { %s1100_s25 = scalar_select %p888_p9, 1, 0 }
  0x15   : > { %s893_s26 = scalar_select %p54_p7, %s798_s14, %s56_s21  }
  0x16   : > { %p895_p11 = por %p131_p10, %p69_p3  ;;  %s902_s28 = sand.u32 1, %s798_s14  }
  0x17   : > { %s533_s29 = sshll.u32 %s902_s28, 3  ;;  %s555_s30 = sshll.u32 %s806_s16, 7 }
  0x18   : > { %s1101_s27 = scalar_select %p895_p11, 1, 0 }
  0x19   : > { %s909_s6 = scalar_lea.hbm %s1092_s0, %s555_s30  ;;  %s183_s7 = scalar_lea.vmem [#allocation2], %s533_s29 }
  0x1a   : > { %s194_s8 = sshll.u32 %s183_s7, 4  ;;  %p915_p0 = pnand %p581_p13, %p878_p4  ;;  %s911_s8 = int_to_ptr.vmem [resolvable:$true] %s194_s8 }
  0x1b   : > { %s180_s10 = scalar_lea.sflag [#allocation3], %s902_s28  ;;  %s632_s11 = scalar_lea.hbm %s909_s6, 128 }
  0x1c   : > { %p633_p3 = scmp.ne.s32.totalorder %s909_s6, %s632_s11  ;;  %p634_p5 = pneg %p915_p0 }
  0x1d   : > { %s637_s21 = scalar_lea.hbm %s1092_s0, 256  ;;  %p638_p4 = scmp.lt.u32.totalorder %s909_s6, %s1092_s0 }
  0x1e   : > { %p635_p6 = pnand %p634_p5, %p633_p3  ;;  %p639_p10 = scmp.lt.u32.totalorder %s637_s21, %s632_s11 }
  0x1f   : > { %p641_p12 = scmp.lt.u32.totalorder %s632_s11, %s909_s6 }
  0x20   : > { %p636_p7 = pneg %p635_p6  ;;  %p640_p13 = por %p639_p10, %p638_p4 }
  0x22   : > { %p642_p1 = por %p641_p12, %p640_p13 }
  0x24   : > { %p643_p2 = pnand %p642_p1, %p636_p7 }
  0x26   : > { %646 = shalt.err (!%p643_p2)
}
  0x27   : > { %s647_s29 = scalar_lea.vmem %s911_s8, 128  ;;  %s812_s30 = smov [#allocation2]  }
  0x28   : > { %p648_p3 = scmp.ne.s32.totalorder %s911_s8, %s647_s29  ;;  %s652_s4 = sshll.u32 %s812_s30, 4  ;;  %s653_s4 = int_to_ptr.vmem [resolvable:$false] %s652_s4 }
  0x29   : > { %s654_s5 = scalar_lea.vmem %s653_s4, 256  ;;  %p655_p9 = scmp.lt.s32.totalorder %s911_s8, %s653_s4 }
  0x2a   : > { %p650_p6 = pnand %p648_p3, %p634_p5  ;;  %p656_p4 = scmp.lt.s32.totalorder %s654_s5, %s647_s29 }
  0x2c   : > { %p651_p11 = pneg %p650_p6  ;;  %p657_p10 = por %p656_p4, %p655_p9 }
  0x2e   : > { %p658_p12 = pnand %p657_p10, %p651_p11 }
  0x30   : > { %661 = shalt.err (!%p658_p12)
}
  0x31   : > { %570 = dma.hbm_to_vmem [thread:$0]  (!%p915_p0), %s909_s6, 128, %s911_s8, %s180_s10  }
  0x32   : > { %p1103_p1 = scmp.lt.s32.totalorder %s810_s17, 3  ;;  %p1104_p2 = scmp.ge.s32.totalorder %s810_s17, 1 }
  0x33   : > { %s536_s11 = sshll.u32 %s902_s28, 1  ;;  %s556_s18 = sshll.u32 %s806_s16, 5 }
  0x34   : > { %p951_p7 = pnand %p1104_p2, %p1103_p1  ;;  %s960_s22 = scalar_lea.hbm %s1093_s1, %s556_s18 }
  0x35   : > { %s205_s23 = scalar_lea.vmem [#allocation5], %s536_s11  ;;  %s202_s6 = scalar_lea.sflag [#allocation6], %s902_s28 }
  0x36   : > { %s1105_s7 = scalar_select %p951_p7, 1, 0 }
  0x37   : > { %s216_s29 = sshll.u32 %s205_s23, 4  ;;  %s662_s8 = scalar_lea.hbm %s960_s22, 32  ;;  %s217_s29 = int_to_ptr.vmem [resolvable:$true] %s216_s29 }
  0x38   : > { %p663_p9 = scmp.ne.s32.totalorder %s960_s22, %s662_s8  ;;  %s667_s4 = scalar_lea.hbm %s1093_s1, 64 }
  0x39   : > { %p668_p3 = scmp.lt.u32.totalorder %s960_s22, %s1093_s1  ;;  %p669_p6 = scmp.lt.u32.totalorder %s667_s4, %s662_s8 }
  0x3a   : > { %p665_p11 = pnand %p663_p9, %p634_p5  ;;  %p671_p10 = scmp.lt.u32.totalorder %s662_s8, %s960_s22 }
  0x3b   : > { %p670_p4 = por %p669_p6, %p668_p3 }
  0x3c   : > { %p666_p13 = pneg %p665_p11 }
  0x3d   : > { %p672_p12 = por %p671_p10, %p670_p4 }
  0x3f   : > { %p673_p1 = pnand %p672_p12, %p666_p13 }
  0x41   : > { %676 = shalt.err (!%p673_p1)
}
  0x42   : > { %s677_s28 = scalar_lea.vmem %s217_s29, 32  ;;  %s813_s11 = smov [#allocation5]  }
  0x43   : > { %p678_p2 = scmp.ne.s32.totalorder %s217_s29, %s677_s28  ;;  %s682_s19 = sshll.u32 %s813_s11, 4  ;;  %s683_s19 = int_to_ptr.vmem [resolvable:$false] %s682_s19 }
  0x44   : > { %s684_s21 = scalar_lea.vmem %s683_s19, 64  ;;  %p685_p8 = scmp.lt.s32.totalorder %s217_s29, %s683_s19 }
  0x45   : > { %p680_p9 = pnand %p678_p2, %p634_p5  ;;  %p686_p7 = scmp.lt.s32.totalorder %s684_s21, %s677_s28 }
  0x47   : > { %p681_p11 = pneg %p680_p9  ;;  %p687_p3 = por %p686_p7, %p685_p8 }
  0x49   : > { %p688_p6 = pnand %p687_p3, %p681_p11 }
  0x4b   : > { %691 = shalt.err (!%p688_p6)
}
  0x4c   : > { %573 = dma.hbm_to_vmem [thread:$0]  (!%p915_p0), %s960_s22, 32, %s217_s29, %s202_s6  }
  0x4d   : > { %p1106_p13 = scmp.ne.s32.totalorder %s1105_s7, 0 }
  0x4e   : > { %s985_s23 = sand.u32 (!%p1106_p13), 1, %s794_s13   ;;  %p1107_p5 = scmp.ne.s32.totalorder (!%p1106_p13), %s1099_s24, 0 }
  0x4f   : > { %225 = sbr.rel (%p1106_p13) target bundleno = 142 (0x8e), region = 28  ;;  %s540_s8 = sshll.u32 (!%p1106_p13), %s985_s23, 3 }
  0x50   : > { %s228_s10 = scalar_lea.sflag (!%p1106_p13), [#allocation3], %s985_s23  ;;  %s231_s30 = scalar_lea.vmem (!%p1106_p13), [#allocation2], %s540_s8 }
  0x56   : > { %773 = dma.done.wait (%p1107_p5), %s228_s10, 128  }
  0x57   : > { %775 = vsyncadd (%p1107_p5), %s228_s10, 4294967168  ;;  %s541_s9 = sshll.u32 %s985_s23, 1  ;;  %s237_s7 = scalar_lea.sflag [#allocation6], %s985_s23 }
  0x58   : > { %s240_s22 = scalar_lea.vmem [#allocation5], %s541_s9 }
  0x59   : > { %777 = dma.done.wait (%p1107_p5), %s237_s7, 32  }
  0x5a   : > { %779 = vsyncadd (%p1107_p5), %s237_s7, 4294967264  ;;  %v277_v0 = vlaneseq  ;;  %s542_s29 = sshll.u32 %s985_s23, 4  ;;  %v280_v4 = vld [vmem:[%s240_s22] sm:$0x3]  ;;  %v279_v5 = vld [vmem:[%s231_s30] sm:$0xff]  ;;  %vm286_vm0 = vcmask 1043456  }
  0x5b   : > { %v544_v8 = vadd.f32 -1.0, %v279_v5  ;;  %s557_s6 = sshll.u32 %s802_s15, 8  ;;  %s265_s4 = scalar_lea.vmem [#allocation7], %s542_s29  ;;  %v814_v10 = vmov 0.0  }
  0x5c   : > { %v278_v1 = vshrl.u32 %v277_v0, 7  ;;  %s363_s24 = sshll.u32 %s265_s4, 4  ;;  %s1009_s28 = scalar_lea.hbm %s1094_s2, %s557_s6  ;;  %s1011_s24 = int_to_ptr.vmem [resolvable:$true] %s363_s24 }
  0x5d   : > { %v282_v9 = vmul.f32 %v544_v8, %v544_v8  ;;  %s342_s11 = scalar_lea.sflag [#allocation4], %s985_s23  ;;  %s692_s19 = scalar_lea.vmem %s1011_s24, 256 }
  0x5e   : > { %v303_v2 = vsub.s32 0, %v278_v1  ;;  %v307_v3 = vsub.s32 1, %v278_v1  ;;  %p693_p8 = scmp.ne.s32.totalorder %s1011_s24, %s692_s19  ;;  %p1108_p0 = scmp.ne.s32.totalorder %s1100_s25, 0 }
  0x5f   : > { %v287_v13 = vsel %vm286_vm0, %v282_v9, 0.0  ;;  %v284_v14 = vcombine.high %v282_v9, %v282_v9  ;;  %s815_s21 = smov [#allocation7]  }
  0x60   : > { %v304_v6 = vrot.slane %v280_v4, %v303_v2  ;;  %v308_v7 = vrot.slane %v280_v4, %v307_v3  ;;  %v288_v15 = vrot.slane %v287_v13, 4  ;;  %p694_p7 = pnand %p693_p8, %p1108_p0  ;;  %s696_s8 = sshll.u32 %s815_s21, 4  ;;  %s697_s8 = int_to_ptr.vmem [resolvable:$false] %s696_s8 }
  0x61   : > { %v294_v16 = vsel %vm286_vm0, %v284_v14, 0.0  ;;  %s698_s10 = scalar_lea.vmem %s697_s8, 512  ;;  %p699_p10 = scmp.lt.s32.totalorder %s1011_s24, %s697_s8 }
  0x62   : > { %vm309_vm1 = vcmp.eq.s32.totalorder %v304_v6, %v278_v1  ;;  %vm310_vm2 = vcmp.eq.s32.totalorder %v308_v7, %v278_v1  ;;  %v289_v17 = vadd.f32 %v288_v15, %v287_v13  ;;  %v295_v18 = vrot.slane %v294_v16, 4  ;;  %p695_p4 = pneg %p694_p7  ;;  %p700_p12 = scmp.lt.s32.totalorder %s698_s10, %s692_s19 }
  0x63   : > { %v545_v11 = vsel %vm309_vm1, 1.0, %v814_v10  ;;  %v546_v12 = vsel %vm310_vm2, 1.0, %v814_v10 }
  0x64   : > { %333 = vst [vmem:[%s265_s4] sm:$0xff] %v545_v11  ;;  %334 = vst [vmem:[%s265_s4 + $0x8] sm:$0xff] %v546_v12  ;;  %p701_p1 = por %p700_p12, %p699_p10 }
  0x66   : > { %p702_p2 = pnand %p701_p1, %p695_p4 }
  0x68   : > { %705 = shalt.err (!%p702_p2)
}
  0x69   : > { %s706_s30 = scalar_lea.hbm %s1009_s28, 256  ;;  %s710_s22 = scalar_lea.hbm %s1094_s2, 512 }
  0x6a   : > { %p707_p9 = scmp.ne.s32.totalorder %s1009_s28, %s706_s30  ;;  %p711_p6 = scmp.lt.u32.totalorder %s1009_s28, %s1094_s2 }
  0x6b   : > { %p712_p13 = scmp.lt.u32.totalorder %s710_s22, %s706_s30  ;;  %p714_p8 = scmp.lt.u32.totalorder %s706_s30, %s1009_s28 }
  0x6c   : > { %p708_p11 = pnand %p707_p9, %p1108_p0 }
  0x6d   : > { %p713_p5 = por %p712_p13, %p711_p6 }
  0x6e   : > { %p709_p3 = pneg %p708_p11 }
  0x6f   : > { %p715_p7 = por %p714_p8, %p713_p5 }
  0x71   : > { %p716_p4 = pnand %p715_p7, %p709_p3 }
  0x73   : > { %719 = shalt.err (!%p716_p4)
}
  0x74   : > { %563 = dma.vmem_to_hbm [thread:$0]  (%p1108_p0), %s1011_s24, 256, %s1009_s28, %s342_s11   ;;  %v290_v19 = vrot.slane %v289_v17, 2  ;;  %v296_v20 = vadd.f32 %v295_v18, %v294_v16 }
  0x75   : > { %s272_s18 = scalar_lea.vmem [#allocation8], %s542_s29  ;;  %s1043_s28 = scalar_lea.hbm %s1095_s3, %s557_s6 }
  0x76   : > { %v291_v21 = vadd.f32 %v290_v19, %v289_v17  ;;  %v297_v22 = vrot.slane %v296_v20, 2  ;;  %s379_s19 = sshll.u32 %s272_s18, 4  ;;  %s347_s11 = scalar_lea.sflag [#allocation9], %s985_s23  ;;  %s1045_s19 = int_to_ptr.vmem [resolvable:$true] %s379_s19 }
  0x77   : > { %s720_s8 = scalar_lea.vmem %s1045_s19, 256  ;;  %s816_s29 = smov [#allocation8]  }
  0x78   : > { %v292_v23 = vrot.slane %v291_v21, 1  ;;  %v298_v24 = vadd.f32 %v297_v22, %v296_v20  ;;  %p721_p10 = scmp.ne.s32.totalorder %s1045_s19, %s720_s8  ;;  %s724_s10 = sshll.u32 %s816_s29, 4  ;;  %s725_s10 = int_to_ptr.vmem [resolvable:$false] %s724_s10 }
  0x79   : > { %s726_s15 = scalar_lea.vmem %s725_s10, 512  ;;  %p727_p2 = scmp.lt.s32.totalorder %s1045_s19, %s725_s10 }
  0x7a   : > { %v293_v25 = vadd.f32 %v292_v23, %v291_v21  ;;  %v299_v26 = vrot.slane %v298_v24, 1  ;;  %p722_p12 = pnand %p721_p10, %p1108_p0  ;;  %p728_p9 = scmp.lt.s32.totalorder %s726_s15, %s720_s8 }
  0x7c   : > { %v317_v27 = vmul.f32 %v545_v11, %v293_v25  ;;  %v300_v28 = vadd.f32 %v299_v26, %v298_v24  ;;  %p723_p1 = pneg %p722_p12  ;;  %p729_p11 = por %p728_p9, %p727_p2 }
  0x7e   : > { %v318_v29 = vmul.f32 %v546_v12, %v300_v28  ;;  %339 = vst [vmem:[%s272_s18] sm:$0xff] %v317_v27  ;;  %p730_p3 = pnand %p729_p11, %p723_p1 }
  0x80   : > { %340 = vst [vmem:[%s272_s18 + $0x8] sm:$0xff] %v318_v29 }
  0x81   : > { %733 = shalt.err (!%p730_p3)
}
  0x82   : > { %s734_s23 = scalar_lea.hbm %s1043_s28, 256  ;;  %s738_s9 = scalar_lea.hbm %s1095_s3, 512 }
  0x83   : > { %p735_p6 = scmp.ne.s32.totalorder %s1043_s28, %s734_s23  ;;  %p739_p8 = scmp.lt.u32.totalorder %s1043_s28, %s1095_s3 }
  0x84   : > { %p740_p7 = scmp.lt.u32.totalorder %s738_s9, %s734_s23  ;;  %p742_p10 = scmp.lt.u32.totalorder %s734_s23, %s1043_s28 }
  0x85   : > { %p736_p13 = pnand %p735_p6, %p1108_p0 }
  0x86   : > { %p741_p4 = por %p740_p7, %p739_p8 }
  0x87   : > { %p737_p5 = pneg %p736_p13 }
  0x88   : > { %p743_p12 = por %p742_p10, %p741_p4 }
  0x8a   : > { %p744_p1 = pnand %p743_p12, %p737_p5 }
  0x8c   : > { %747 = shalt.err (!%p744_p1)
}
  0x8d   : > { %564 = dma.vmem_to_hbm [thread:$0]  (%p1108_p0), %s1045_s19, 256, %s1043_s28, %s347_s11  }
  0x8e PF: > { %s391_s4 = sand.u32 1, %s790_s12   ;;  %p1109_p2 = scmp.ne.s32.totalorder %s1101_s27, 0 }
  0x8f   : > { %p1110_p9 = scmp.ge.s32.totalorder %s810_s17, 2  ;;  %s392_s5 = scalar_lea.sflag [#allocation4], %s391_s4 }
  0x91   : > { %p575_p11 = pnand %p1110_p9, %p1109_p2 }
  0x93   : > { %781 = dma.done.wait (!%p575_p11), %s392_s5, 256  }
  0x94   : > { %783 = vsyncadd (!%p575_p11), %s392_s5, 4294967040  ;;  %s401_s18 = scalar_lea.sflag [#allocation9], %s391_s4 }
  0x95   : > { %785 = dma.done.wait (!%p575_p11), %s401_s18, 256  }
  0x96   : > { %787 = vsyncadd (!%p575_p11), %s401_s18, 4294967040  ;;  %s26_s17 = sadd.s32 1, %s810_s17   ;;  %s1111_s12 = smov %s794_s13 }
  0x97   : > { %p23_p3 = scmp.ge.s32.totalorder %s26_s17, 4   ;;  %s1112_s13 = smov %s798_s14 }
  0x98   : > { %s1113_s14 = smov %s893_s26  ;;  %s1114_s15 = smov %s806_s16 }
  0x99   : > { %s1115_s16 = smov %s1117_s20  ;;  %25 = sbr.rel (!%p23_p3) target bundleno = 10 (0xa), region = 107 }
  0xa0   :  { %406 = vsyncpa [#allocation3], 1 }
  0xa1   :  { %408 = vsyncpa [#allocation3 + $0x1], 1 }
  0xa2   :  { %409 = vsyncpa [#allocation6], 1 }
  0xa3   :  { %411 = vsyncpa [#allocation6 + $0x1], 1 }
  0xa4   :  { %412 = vsyncpa [#allocation4], 1 }
  0xa5   :  { %414 = vsyncpa [#allocation4 + $0x1], 1 }
  0xa6   :  { %415 = vsyncpa [#allocation9], 1 }
  0xa7   :  { %417 = vsyncpa [#allocation9 + $0x1], 1 }

</bundles_post_ra>
